<compile_context>
chip_gen: v7x
topology: tpu7x:2x2x1
jax: 0.10.0
libtpu: 0.0.40
codegen_flags: <defaults>
</compile_context>

<pallas_src>
import math

import jax
import jax.numpy as jnp
from jax.experimental import pallas as pl
from jax.experimental.pallas import tpu as pltpu


def _constrained_dropout_kernel(x_ref, mask_ref, o_ref):
    # x_ref: (TR, TL) input tile; mask_ref: (1, TL) fp32 mask slice (broadcast
    # over sublanes).  Promote to the output dtype (fp32 for fp16/bf16 x, like
    # torch) so the 1/(1-p) scale is not rounded to a narrow dtype.
    o_ref[...] = x_ref[...].astype(o_ref.dtype) * mask_ref[...].astype(o_ref.dtype)


def _tile_policy(rows, lane, x_bytes, out_bytes, mask_bytes):
    """Generation-aware (tile_rows, lane_tile, grid, vmem_limit)."""
    # Sublane packing of the narrowest operand: 8 rows/vreg for 32-bit,
    # 16 for 16-bit, 32 for 8-bit.  Tiles that are multiples of this satisfy
    # every operand's layout.
    pack = 8 * max(1, 4 // min(x_bytes, out_bytes))

    # Physical VMEM: 128 MiB on v5e/v6e, 64 MiB per TensorCore on v7x.
    try:
        vmem_cap = int(pltpu.get_tpu_info().vmem_capacity_bytes)
    except Exception:
        vmem_cap = 64 * 1024 * 1024  # conservative (v7x) fallback
    if vmem_cap >= 96 * 1024 * 1024:        # v5e / v6e
        block_budget = 48 * 1024 * 1024     # 2x-buffered in+out blocks (~12 MiB each)
        nominal_limit = 80 * 1024 * 1024
    else:                                   # v7x
        block_budget = 40 * 1024 * 1024     # keep live blocks well under 64 MiB
        nominal_limit = 52 * 1024 * 1024

    per_elem = x_bytes + out_bytes          # one x block + one out block, each 2x-buffered

    # Lane tile: full lane width unless a pack-row block already blows the
    # budget (only for very large 128-aligned feature dims).
    lane_tile = lane
    if lane % 128 == 0:
        max_lane = block_budget // (2 * pack * per_elem)
        max_lane = max(128, (max_lane // 128) * 128)
        lane_tile = min(lane, max_lane)

    # Row tile: purely byte-budget driven (no hard row cap), rounded to the
    # packing multiple.  Full-dim blocks are always layout-legal.
    max_rows = max(1, block_budget // (2 * lane_tile * per_elem))
    tile_rows = min(rows, max_rows)
    tile_rows = max(pack, (tile_rows // pack) * pack)
    tile_rows = min(tile_rows, rows)

    # Keep >= ~4 grid steps on non-trivial inputs (>= 2 per v7x TensorCore and
    # an i+1 block to prefetch).  Tiny inputs stay single-step (launch-bound).
    min_steps = 4
    row_steps = pl.cdiv(rows, tile_rows)
    lane_steps = pl.cdiv(lane, lane_tile)
    total_bytes = rows * lane * per_elem
    if (row_steps * lane_steps < min_steps
            and rows >= min_steps * pack
            and total_bytes >= (4 << 20)):
        tile_rows = max(pack, ((rows // min_steps) // pack) * pack)

    grid = (pl.cdiv(rows, tile_rows), pl.cdiv(lane, lane_tile))

    # vmem_limit from the *actual* block bytes (handles the pathological
    # huge-unaligned-lane case where tile_rows is forced up to `pack`).
    block_bytes = 2 * tile_rows * lane_tile * per_elem + 2 * lane_tile * mask_bytes
    vmem_limit = max(32 * 1024 * 1024, int(1.35 * block_bytes))
    vmem_limit = min(vmem_limit, nominal_limit)
    vmem_limit = max(vmem_limit, min(vmem_cap - (8 << 20), block_bytes + (2 << 20)))

    return tile_rows, lane_tile, grid, int(vmem_limit)


def _constrained_dropout_2d(x2d, mask2d, out_dtype):
    rows, lane = x2d.shape
    xb = jnp.dtype(x2d.dtype).itemsize
    ob = jnp.dtype(out_dtype).itemsize
    mb = jnp.dtype(mask2d.dtype).itemsize

    tile_rows, lane_tile, grid, vmem_limit = _tile_policy(rows, lane, xb, ob, mb)

    return pl.pallas_call(
        _constrained_dropout_kernel,
        out_shape=jax.ShapeDtypeStruct((rows, lane), out_dtype),
        grid=grid,
        in_specs=[
            pl.BlockSpec((tile_rows, lane_tile), lambda i, j: (i, j)),   # x tile
            pl.BlockSpec((1, lane_tile), lambda i, j: (0, j)),           # mask slice
        ],
        out_specs=pl.BlockSpec((tile_rows, lane_tile), lambda i, j: (i, j)),
        compiler_params=pltpu.CompilerParams(
            dimension_semantics=("parallel", "parallel"),
            vmem_limit_bytes=vmem_limit,
        ),
    )(x2d, mask2d)


class ConstraitedDropout:
    """JAX/Pallas port of fairseq ConstraitedDropout (forward pass)."""

    def __init__(self, p, sample_num, feature_dim, *, key):
        self.p = float(p)
        self.sample_num = int(sample_num)
        self.feature_dim = int(feature_dim)
        # Deterministic buffer init, mirroring:
        #   mask = (rand((sample_num, feature_dim)) > p).float() / (1 - p)
        u = jax.random.uniform(key, (sample_num, feature_dim), dtype=jnp.float32)
        self.dropout_mask = (u > self.p).astype(jnp.float32) / (1.0 - self.p)
        self.training = True

    def __call__(self, x, rng_key):
        if not (self.p > 0 and self.training):
            return x

        d = self.feature_dim
        assert x.shape[-1] == d, (
            f"trailing dim {x.shape[-1]} != feature_dim {d}; mask would misalign"
        )

        # torch: fp16/bf16 x * fp32 mask -> fp32 output.  Match that promotion.
        out_dtype = jnp.promote_types(x.dtype, self.dropout_mask.dtype)

        # Scalar index selection + single-row gather are glue (plain JAX);
        # the mask row stays fp32 so 1/(1-p) is not rounded.
        mask_index = jax.random.randint(
            rng_key, (1,), 0, self.sample_num, dtype=jnp.int32
        )
        mask_row = self.dropout_mask[mask_index[0]]

        n = x.size
        # Lane-dense layout: fold consecutive rows into the lane dim so the
        # last dim is a multiple of 128 (avoids masked vst partial stores for
        # narrow feature dims).  The mask row is tiled to match the fold.
        if d % 128 == 0:
            lane, repeat = d, 1
        else:
            folded = math.lcm(d, 128)
            if n % folded == 0 and folded <= 65536:
                lane, repeat = folded, folded // d
            else:
                # TODO(synk): rare masked-store fallback (lane = d, d % 128 != 0
                # and rows not divisible by the fold factor); pad the trailing
                # dim to a multiple of 128 in glue if this path ever gets hot.
                lane, repeat = d, 1

        rows = n // lane
        x2d = x.reshape(rows, lane)
        mask2d = (jnp.tile(mask_row, repeat) if repeat > 1 else mask_row).reshape(1, lane)

        out2d = _constrained_dropout_2d(x2d, mask2d, out_dtype)
        return out2d.reshape(x.shape)


if __name__ == "__main__":
    key = jax.random.PRNGKey(0)
    k_init, k_x, k_idx = jax.random.split(key, 3)

    batch, seq, hidden = 2, 8, 32
    p, sample_num = 0.5, 4

    module = ConstraitedDropout(p, sample_num, hidden, key=k_init)
    x = jax.random.normal(k_x, (batch, seq, hidden), dtype=jnp.float32)

    out = module(x, k_idx)
    out = jax.block_until_ready(out)

    # quick sanity check against pure-JAX reference
    mask_index = jax.random.randint(k_idx, (1,), 0, sample_num, dtype=jnp.int32)
    ref = x * module.dropout_mask[mask_index[0]]
    assert out.shape == x.shape
    assert out.dtype == jnp.promote_types(x.dtype, jnp.float32)
    assert jnp.allclose(out, ref, atol=1e-6), "mismatch vs reference"

    print("KERNEL_OK")
</pallas_src>

<mosaic_0001>
module attributes {stable_mosaic.version = 11 : i64} {
  func.func @_constrained_dropout_kernel(%arg0: i32, %arg1: i32, %arg2: memref<4x128xf32, #tpu.memory_space<vmem>>, %arg3: memref<1x128xf32, #tpu.memory_space<vmem>>, %arg4: memref<4x128xf32, #tpu.memory_space<vmem>>) attributes {dimension_semantics = [#tpu.dimension_semantics<parallel>, #tpu.dimension_semantics<parallel>], iteration_bounds = array<i64: 1, 1>, scalar_prefetch = 0 : i64, scratch_operands = 0 : i64, tpu.core_type = #tpu.core_type<tc>, window_params = [{transform_indices = @transform_0, window_bounds = array<i64: 4, 128>}, {transform_indices = @transform_1, window_bounds = array<i64: 1, 128>}, {transform_indices = @transform_2, window_bounds = array<i64: 4, 128>}]} {
    %c0 = arith.constant 0 : index
    %c0_0 = arith.constant 0 : index
    %0 = vector.load %arg2[%c0, %c0_0] : memref<4x128xf32, #tpu.memory_space<vmem>>, vector<4x128xf32>
    %c0_1 = arith.constant 0 : index
    %c0_2 = arith.constant 0 : index
    %1 = vector.load %arg3[%c0_1, %c0_2] : memref<1x128xf32, #tpu.memory_space<vmem>>, vector<1x128xf32>
    %2 = vector.broadcast %1 : vector<1x128xf32> to vector<4x128xf32>
    %3 = arith.mulf %0, %2 : vector<4x128xf32>
    %c0_3 = arith.constant 0 : index
    %c0_4 = arith.constant 0 : index
    %4 = vector.load %arg4[%c0_3, %c0_4] : memref<4x128xf32, #tpu.memory_space<vmem>>, vector<4x128xf32>
    tpu.vector_store %arg4[%c0_3, %c0_4], %3 {strides = array<i32>} : memref<4x128xf32, #tpu.memory_space<vmem>>, vector<4x128xf32>,
    return
  }
  func.func @transform_0(%arg0: i32, %arg1: i32) -> (i32, i32) {
    %c0_i32 = arith.constant 0 : i32
    return %arg0, %arg1 : i32, i32
  }
  func.func @transform_1(%arg0: i32, %arg1: i32) -> (i32, i32) {
    %c0_i32 = arith.constant 0 : i32
    %c0_i32_0 = arith.constant 0 : i32
    return %c0_i32, %arg1 : i32, i32
  }
  func.func @transform_2(%arg0: i32, %arg1: i32) -> (i32, i32) {
    %c0_i32 = arith.constant 0 : i32
    return %arg0, %arg1 : i32, i32
  }
}

</mosaic_0001>

<bundles_post_ra>
// kernel: tpu_custom_call.1
= control target key start
LH: loop header
LB: loop body
LE: loop exit
PB: predicated region body
PF: predicated region fallthrough
CT: control target
= control target key end

     0   :  { %7 = vsyncpa [#allocation3], 0  ;;  %s144_s0 = inlined_call_operand.hbm [shape: f32[4,128], index: 0, kind: input, shape index: {}]   ;;  %s145_s1 = inlined_call_operand.vmem [shape: f32[1,128], index: 1, kind: input, shape index: {}]   ;;  %s146_s2 = inlined_call_operand.hbm [shape: f32[4,128], index: 2, kind: output, shape index: {}]  }
   0x1   :  { %8 = vsyncpa [#allocation4], 0  ;;  %s100_s9 = smov [#allocation2]   ;;  %s52_s13 = scalar_lea.hbm %s144_s0, 64 }
   0x2   :  { %s15_s10 = sshll.u32 %s100_s9, 4  ;;  %p53_p0 = scmp.ne.s32.totalorder %s144_s0, %s52_s13  ;;  %s16_s10 = int_to_ptr.vmem [resolvable:$true] %s15_s10 }
   0x3   :  { %p56_p1 = scmp.lt.u32.totalorder %s52_s13, %s144_s0 }
   0x5   :  { %p58_p2 = pnand %p56_p1, %p53_p0 }
   0x7   :  { %61 = shalt.err (!%p58_p2)
}
   0x8   :  { %s62_s18 = scalar_lea.vmem %s16_s10, 64  ;;  %p67_p4 = scmp.lt.s32.totalorder %s16_s10, %s16_s10 }
   0x9   :  { %p63_p3 = scmp.ne.s32.totalorder %s16_s10, %s62_s18  ;;  %p68_p5 = scmp.lt.s32.totalorder %s62_s18, %s62_s18 }
   0xb   :  { %p69_p6 = por %p68_p5, %p67_p4 }
   0xd   :  { %p70_p7 = pnand %p69_p6, %p63_p3 }
   0xf   :  { %73 = shalt.err (!%p70_p7)
}
  0x10   :  { %18 = dma.hbm_to_vmem [thread:$0]  %s144_s0, 64, %s16_s10, [#allocation3]  }
  0x11   :  { %96 = dma.done.wait [#allocation3], 64  }
  0x12   :  { %97 = vsyncadd [#allocation3], 4294967232  ;;  %s101_s21 = smov [#allocation5]   ;;  %v24_v0 = vld [vmem:[#allocation2] sm:$0xf] }
  0x13   :  { %s40_s22 = sshll.u32 %s101_s21, 4  ;;  %v49_v1 = vld [vmem:[%s145_s1] ss:$0 sm:$0xff]  ;;  %s41_s22 = int_to_ptr.vmem [resolvable:$true] %s40_s22 }
  0x14   :  { %v32_v2 = vmul.f32 %v49_v1, %v24_v0  ;;  %s74_s25 = scalar_lea.vmem %s41_s22, 64  ;;  %p79_p9 = scmp.lt.s32.totalorder %s41_s22, %s41_s22 }
  0x15   :  { %p75_p8 = scmp.ne.s32.totalorder %s41_s22, %s74_s25  ;;  %p80_p10 = scmp.lt.s32.totalorder %s74_s25, %s74_s25 }
  0x16   :  { %33 = vst [vmem:[#allocation5] sm:$0xf] %v32_v2 }
  0x17   :  { %p81_p11 = por %p80_p10, %p79_p9 }
  0x19   :  { %p82_p12 = pnand %p81_p11, %p75_p8 }
  0x1b   :  { %85 = shalt.err (!%p82_p12)
}
  0x1c   :  { %s86_s27 = scalar_lea.hbm %s146_s2, 64 }
  0x1d   :  { %p87_p13 = scmp.ne.s32.totalorder %s146_s2, %s86_s27  ;;  %p90_p0 = scmp.lt.u32.totalorder %s86_s27, %s146_s2 }
  0x1f   :  { %p92_p1 = pnand %p90_p0, %p87_p13 }
  0x21   :  { %95 = shalt.err (!%p92_p1)
}
  0x22   :  { %43 = dma.vmem_to_hbm [thread:$0]  %s41_s22, 64, %s146_s2, [#allocation4]  }
  0x23   :  { %98 = dma.done.wait [#allocation4], 64  }
  0x24   :  { %99 = vsyncadd [#allocation4], 4294967232 }
  0x25   :  { %47 = vsyncpa [#allocation3], 1 }
  0x26   :  { %48 = vsyncpa [#allocation4], 1 }

</bundles_post_ra>
